<compile_context>
chip_gen: v5e
topology: v5e:2x2
jax: 0.10.0
libtpu: 0.0.40
codegen_flags: <defaults>
</compile_context>

<pallas_src>
import functools

import jax
import jax.numpy as jnp
from jax.experimental import pallas as pl
from jax.experimental.pallas import tpu as pltpu


def _se_kernel(x_ref, w1t_ref, b1_ref, w2t_ref, b2_ref, o_ref, acc_ref,
               *, hw, spatial_tile, need_mask):
    """One (batch-row, spatial-tile) grid step.

    x_ref   : (1, C, TS)   tile of the flattened input
    acc_ref : (1, C) f32   running spatial sum (resident across the s axis)
    o_ref   : (1, 1, C)    final gate, written once in the epilogue
    """
    s = pl.program_id(1)

    @pl.when(s == 0)
    def _():
        acc_ref[...] = jnp.zeros_like(acc_ref)

    # Per-tile f32 cast + partial lane reduction (free under the HBM DMA).
    x_tile = x_ref[...].astype(jnp.float32)                     # (1, C, TS)
    if need_mask:  # static Python bool -> no cost when tiling is even
        lane = jax.lax.broadcasted_iota(jnp.int32, x_tile.shape, 2)
        x_tile = jnp.where(lane + s * spatial_tile < hw, x_tile, 0.0)
    acc_ref[...] += jnp.sum(x_tile, axis=-1)                    # (1, C)

    # Epilogue: tiny FCs + sigmoid, executed exactly once per batch row.
    @pl.when(s == pl.num_programs(1) - 1)
    def _():
        pooled = acc_ref[...] * (1.0 / hw)                      # (1, C)
        w1t = w1t_ref[...].astype(jnp.float32)                  # (C, Cmid)
        b1 = b1_ref[...].astype(jnp.float32)                    # (1, Cmid)
        h = jnp.dot(pooled, w1t, preferred_element_type=jnp.float32) + b1
        h = jnp.maximum(h, 0.0)                                 # ReLU
        w2t = w2t_ref[...].astype(jnp.float32)                  # (Cmid, C)
        b2 = b2_ref[...].astype(jnp.float32)                    # (1, C)
        y = jnp.dot(h, w2t, preferred_element_type=jnp.float32) + b2
        o_ref[...] = jax.nn.sigmoid(y).astype(o_ref.dtype).reshape(o_ref.shape)


def _choose_spatial_tile(hw, c, dtype_bytes, max_tile_bytes):
    """Largest 128-multiple spatial tile fitting max_tile_bytes per buffer."""
    if hw <= 128:
        return hw                      # full extent satisfies the lane rule
    budget_lanes = max(128, max_tile_bytes // max(1, c * dtype_bytes))
    ts = min(hw, budget_lanes)
    return max(128, (ts // 128) * 128)


def se_forward(x, w1, b1, w2, b2, *, spatial_tile=None, max_tile_bytes=4 << 20):
    """x: (N, C, H, W); w1: (Cmid, C); b1: (Cmid,); w2: (C, Cmid); b2: (C,)."""
    N, C, H, W = x.shape
    Cmid = w1.shape[0]
    hw = H * W

    x_flat = x.reshape(N, C, hw)          # layout plumbing only
    w1t = w1.T                            # (C, Cmid)
    w2t = w2.T                            # (Cmid, C)
    b1_2d = b1.reshape(1, Cmid)
    b2_2d = b2.reshape(1, C)

    dtype_bytes = jnp.dtype(x.dtype).itemsize
    if spatial_tile is None:
        ts = _choose_spatial_tile(hw, C, dtype_bytes, max_tile_bytes)
    else:
        ts = min(int(spatial_tile), hw)
    num_s = pl.cdiv(hw, ts)
    need_mask = (hw % ts) != 0

    kernel = functools.partial(
        _se_kernel, hw=hw, spatial_tile=ts, need_mask=need_mask)

    grid_spec = pltpu.PrefetchScalarGridSpec(
        num_scalar_prefetch=0,
        grid=(N, num_s),                  # reduction (spatial) axis last
        in_specs=[
            pl.BlockSpec((1, C, ts), lambda n, s: (n, 0, s)),    # x tile
            pl.BlockSpec((C, Cmid), lambda n, s: (0, 0)),        # w1^T resident
            pl.BlockSpec((1, Cmid), lambda n, s: (0, 0)),        # b1 resident
            pl.BlockSpec((Cmid, C), lambda n, s: (0, 0)),        # w2^T resident
            pl.BlockSpec((1, C), lambda n, s: (0, 0)),           # b2 resident
        ],
        out_specs=pl.BlockSpec((1, 1, C), lambda n, s: (n, 0, 0)),
        scratch_shapes=[pltpu.VMEM((1, C), jnp.float32)],        # f32 accumulator
    )

    out = pl.pallas_call(
        kernel,
        out_shape=jax.ShapeDtypeStruct((N, 1, C), x.dtype),
        grid_spec=grid_spec,
        compiler_params=pltpu.CompilerParams(
            dimension_semantics=("parallel", "arbitrary"),
            vmem_limit_bytes=32 << 20,    # safe on v7x (64 MiB) and v5e/v6e
        ),
    )(x_flat, w1t, b1_2d, w2t, b2_2d)

    return out.reshape(N, C, 1, 1)


def se_reference(x, w1, b1, w2, b2):
    """Pure-JAX reference mirroring the PyTorch module."""
    pooled = jnp.mean(x, axis=(2, 3))                       # (N, C)
    h = jnp.maximum(pooled @ w1.T + b1, 0.0)                # (N, Cmid)
    y = h @ w2.T + b2                                       # (N, C)
    return jax.nn.sigmoid(y)[:, :, None, None]


if __name__ == "__main__":
    def run_case(key, N, C, H, W, ratio, spatial_tile):
        Cmid = max(1, C // ratio)
        kx, k1, k2, k3, k4 = jax.random.split(key, 5)
        x = jax.random.normal(kx, (N, C, H, W), dtype=jnp.float32)
        w1 = jax.random.normal(k1, (Cmid, C), dtype=jnp.float32) * 0.1
        b1 = jax.random.normal(k2, (Cmid,), dtype=jnp.float32) * 0.1
        w2 = jax.random.normal(k3, (C, Cmid), dtype=jnp.float32) * 0.1
        b2 = jax.random.normal(k4, (C,), dtype=jnp.float32) * 0.1

        out = se_forward(x, w1, b1, w2, b2, spatial_tile=spatial_tile)
        jax.block_until_ready(out)

        ref = se_reference(x, w1, b1, w2, b2)
        assert out.shape == (N, C, 1, 1)
        assert jnp.allclose(out, ref, atol=1e-5, rtol=1e-5), (
            f"max err {jnp.max(jnp.abs(out - ref))}")

    key = jax.random.PRNGKey(0)
    ka, kb, kc = jax.random.split(key, 3)

    # SE(in_chnls=8, ratio=4): even tiling, 2 spatial grid steps (HW=256).
    run_case(ka, N=2, C=8, H=16, W=16, ratio=4, spatial_tile=128)
    # Uneven spatial extent: HW=400, tile=128 -> 4 steps with masked tail.
    run_case(kb, N=2, C=8, H=20, W=20, ratio=4, spatial_tile=128)
    # Auto-chosen tile (single step for this small shape).
    run_case(kc, N=2, C=8, H=16, W=16, ratio=4, spatial_tile=None)

    print("KERNEL_OK")
</pallas_src>

<mosaic_0001>
module attributes {stable_mosaic.version = 11 : i64} {
  func.func @_se_kernel(%arg0: i32, %arg1: i32, %arg2: memref<1x8x128xf32, #tpu.memory_space<vmem>>, %arg3: memref<8x2xf32, #tpu.memory_space<vmem>>, %arg4: memref<1x2xf32, #tpu.memory_space<vmem>>, %arg5: memref<2x8xf32, #tpu.memory_space<vmem>>, %arg6: memref<1x8xf32, #tpu.memory_space<vmem>>, %arg7: memref<1x1x8xf32, #tpu.memory_space<vmem>>, %arg8: memref<1x8xf32, #tpu.memory_space<vmem>>) attributes {dimension_semantics = [#tpu.dimension_semantics<parallel>, #tpu.dimension_semantics<arbitrary>], iteration_bounds = array<i64: 2, 2>, scalar_prefetch = 0 : i64, scratch_operands = 1 : i64, tpu.core_type = #tpu.core_type<tc>, window_params = [{transform_indices = @transform_0, window_bounds = array<i64: 1, 8, 128>}, {pipeline_mode = #tpu.pipeline_mode<synchronous>, transform_indices = @transform_1, window_bounds = array<i64: 8, 2>}, {pipeline_mode = #tpu.pipeline_mode<synchronous>, transform_indices = @transform_2, window_bounds = array<i64: 1, 2>}, {pipeline_mode = #tpu.pipeline_mode<synchronous>, transform_indices = @transform_3, window_bounds = array<i64: 2, 8>}, {pipeline_mode = #tpu.pipeline_mode<synchronous>, transform_indices = @transform_4, window_bounds = array<i64: 1, 8>}, {transform_indices = @transform_5, window_bounds = array<i64: 1, 1, 8>}]} {
    %c0_i32 = arith.constant 0 : i32
    %0 = arith.cmpi eq, %arg1, %c0_i32 : i32
    %1 = arith.extui %0 : i1 to i32
    %c0_i32_0 = arith.constant 0 : i32
    %2 = arith.cmpi ne, %1, %c0_i32_0 : i32
    scf.if %2 {
      %cst_8 = arith.constant 0.000000e+00 : f32
      %11 = vector.broadcast %cst_8 : f32 to vector<1x8xf32>
      %c0_9 = arith.constant 0 : index
      %c0_10 = arith.constant 0 : index
      %12 = vector.load %arg8[%c0_9, %c0_10] : memref<1x8xf32, #tpu.memory_space<vmem>>, vector<1x8xf32>
      tpu.vector_store %arg8[%c0_9, %c0_10], %11 {strides = array<i32>} : memref<1x8xf32, #tpu.memory_space<vmem>>, vector<1x8xf32>,
    } else {
    }
    %c0 = arith.constant 0 : index
    %c0_1 = arith.constant 0 : index
    %c0_2 = arith.constant 0 : index
    %3 = vector.load %arg2[%c0, %c0_1, %c0_2] : memref<1x8x128xf32, #tpu.memory_space<vmem>>, vector<1x8x128xf32>
    %c0_3 = arith.constant 0 : index
    %c0_4 = arith.constant 0 : index
    %4 = vector.load %arg8[%c0_3, %c0_4] : memref<1x8xf32, #tpu.memory_space<vmem>>, vector<1x8xf32>
    %cst = arith.constant dense<0.000000e+00> : vector<1x8xf32>
    %5 = vector.multi_reduction <add>, %3, %cst [2] : vector<1x8x128xf32> to vector<1x8xf32>
    %6 = arith.addf %4, %5 : vector<1x8xf32>
    %c0_5 = arith.constant 0 : index
    %c0_6 = arith.constant 0 : index
    %7 = vector.load %arg8[%c0_5, %c0_6] : memref<1x8xf32, #tpu.memory_space<vmem>>, vector<1x8xf32>
    tpu.vector_store %arg8[%c0_5, %c0_6], %6 {strides = array<i32>} : memref<1x8xf32, #tpu.memory_space<vmem>>, vector<1x8xf32>,
    %c1_i32 = arith.constant 1 : i32
    %8 = arith.cmpi eq, %arg1, %c1_i32 : i32
    %9 = arith.extui %8 : i1 to i32
    %c0_i32_7 = arith.constant 0 : i32
    %10 = arith.cmpi ne, %9, %c0_i32_7 : i32
    scf.if %10 {
      %c0_8 = arith.constant 0 : index
      %c0_9 = arith.constant 0 : index
      %11 = vector.load %arg8[%c0_8, %c0_9] : memref<1x8xf32, #tpu.memory_space<vmem>>, vector<1x8xf32>
      %cst_10 = arith.constant 3.906250e-03 : f32
      %12 = vector.broadcast %cst_10 : f32 to vector<1x8xf32>
      %13 = arith.mulf %11, %12 : vector<1x8xf32>
      %c0_11 = arith.constant 0 : index
      %c0_12 = arith.constant 0 : index
      %14 = vector.load %arg3[%c0_11, %c0_12] : memref<8x2xf32, #tpu.memory_space<vmem>>, vector<8x2xf32>
      %c0_13 = arith.constant 0 : index
      %c0_14 = arith.constant 0 : index
      %15 = vector.load %arg4[%c0_13, %c0_14] : memref<1x2xf32, #tpu.memory_space<vmem>>, vector<1x2xf32>
      %cst_15 = arith.constant dense<0.000000e+00> : vector<1x2xf32>
      %16 = tpu.matmul %13, %14, %cst_15 {dimension_numbers = #tpu.dot_dimension_numbers<[1], [0], [0], [1], [0, 0, 1, 1], [], []>} : vector<1x8xf32>, vector<8x2xf32>, vector<1x2xf32> -> vector<1x2xf32>
      %17 = arith.addf %16, %15 : vector<1x2xf32>
      %cst_16 = arith.constant 0.000000e+00 : f32
      %18 = vector.broadcast %cst_16 : f32 to vector<1x2xf32>
      %19 = arith.maximumf %17, %18 : vector<1x2xf32>
      %c0_17 = arith.constant 0 : index
      %c0_18 = arith.constant 0 : index
      %20 = vector.load %arg5[%c0_17, %c0_18] : memref<2x8xf32, #tpu.memory_space<vmem>>, vector<2x8xf32>
      %c0_19 = arith.constant 0 : index
      %c0_20 = arith.constant 0 : index
      %21 = vector.load %arg6[%c0_19, %c0_20] : memref<1x8xf32, #tpu.memory_space<vmem>>, vector<1x8xf32>
      %cst_21 = arith.constant dense<0.000000e+00> : vector<1x8xf32>
      %22 = tpu.matmul %19, %20, %cst_21 {dimension_numbers = #tpu.dot_dimension_numbers<[1], [0], [0], [1], [0, 0, 1, 1], [], []>} : vector<1x2xf32>, vector<2x8xf32>, vector<1x8xf32> -> vector<1x8xf32>
      %23 = arith.addf %22, %21 : vector<1x8xf32>
      %24 = arith.negf %23 : vector<1x8xf32>
      %25 = math.exp %24 : vector<1x8xf32>
      %cst_22 = arith.constant 1.000000e+00 : f32
      %26 = vector.broadcast %cst_22 : f32 to vector<1x8xf32>
      %27 = arith.addf %26, %25 : vector<1x8xf32>
      %28 = arith.divf %26, %27 : vector<1x8xf32>
      %29 = vector.shape_cast %28 : vector<1x8xf32> to vector<1x1x8xf32>
      %c0_23 = arith.constant 0 : index
      %c0_24 = arith.constant 0 : index
      %c0_25 = arith.constant 0 : index
      %30 = vector.load %arg7[%c0_23, %c0_24, %c0_25] : memref<1x1x8xf32, #tpu.memory_space<vmem>>, vector<1x1x8xf32>
      tpu.vector_store %arg7[%c0_23, %c0_24, %c0_25], %29 {strides = array<i32>} : memref<1x1x8xf32, #tpu.memory_space<vmem>>, vector<1x1x8xf32>,
    } else {
    }
    return
  }
  func.func @transform_0(%arg0: i32, %arg1: i32) -> (i32, i32, i32) {
    %c0_i32 = arith.constant 0 : i32
    %c0_i32_0 = arith.constant 0 : i32
    return %arg0, %c0_i32, %arg1 : i32, i32, i32
  }
  func.func @transform_1(%arg0: i32, %arg1: i32) -> (i32, i32) {
    %c0_i32 = arith.constant 0 : i32
    %c0_i32_0 = arith.constant 0 : i32
    %c0_i32_1 = arith.constant 0 : i32
    return %c0_i32, %c0_i32_0 : i32, i32
  }
  func.func @transform_2(%arg0: i32, %arg1: i32) -> (i32, i32) {
    %c0_i32 = arith.constant 0 : i32
    %c0_i32_0 = arith.constant 0 : i32
    %c0_i32_1 = arith.constant 0 : i32
    return %c0_i32, %c0_i32_0 : i32, i32
  }
  func.func @transform_3(%arg0: i32, %arg1: i32) -> (i32, i32) {
    %c0_i32 = arith.constant 0 : i32
    %c0_i32_0 = arith.constant 0 : i32
    %c0_i32_1 = arith.constant 0 : i32
    return %c0_i32, %c0_i32_0 : i32, i32
  }
  func.func @transform_4(%arg0: i32, %arg1: i32) -> (i32, i32) {
    %c0_i32 = arith.constant 0 : i32
    %c0_i32_0 = arith.constant 0 : i32
    %c0_i32_1 = arith.constant 0 : i32
    return %c0_i32, %c0_i32_0 : i32, i32
  }
  func.func @transform_5(%arg0: i32, %arg1: i32) -> (i32, i32, i32) {
    %c0_i32 = arith.constant 0 : i32
    %c0_i32_0 = arith.constant 0 : i32
    %c0_i32_1 = arith.constant 0 : i32
    return %arg0, %c0_i32, %c0_i32_0 : i32, i32, i32
  }
}

</mosaic_0001>

<bundles_post_ra>
// kernel: tpu_custom_call.1
= control target key start
LH: loop header
LB: loop body
LE: loop exit
PB: predicated region body
PF: predicated region fallthrough
CT: control target
= control target key end

     0   :  { %10 = vsyncpa [#allocation4], 0  ;;  %s979_s0 = inlined_call_operand.hbm [shape: f32[2,8,256], index: 0, kind: input, shape index: {}]   ;;  %s980_s1 = inlined_call_operand.vmem [shape: f32[8,2], index: 1, kind: input, shape index: {}]   ;;  %s981_s2 = inlined_call_operand.vmem [shape: f32[1,2], index: 2, kind: input, shape index: {}]   ;;  %s982_s3 = inlined_call_operand.vmem [shape: f32[2,8], index: 3, kind: input, shape index: {}]   ;;  %s983_s4 = inlined_call_operand.vmem [shape: f32[1,8], index: 4, kind: input, shape index: {}]   ;;  %s984_s5 = inlined_call_operand.hbm [shape: f32[2,1,8], index: 5, kind: output, shape index: {}]  }
   0x1   :  { %12 = vsyncpa [#allocation4 + $0x1], 0 }
   0x2   :  { %13 = vsyncpa [#allocation5], 0 }
   0x3   :  { %15 = vsyncpa [#allocation5 + $0x1], 0  ;;  %s789_s18 = smov 0   ;;  %s791_s19 = smov 0  }
   0x4   :  { %s793_s20 = smov 0   ;;  %s795_s21 = smov 0  }
   0x5   :  { %s797_s22 = smov 0   ;;  %s799_s23 = smov 0  }
   0x6   :  { %s801_s24 = smov 0   ;;  %s803_s25 = smov 0  }
   0x7   :  { %s805_s26 = smov 0   ;;  %s807_s27 = smov 0  }
   0x8   :  { %s809_s28 = smov 0  }
   0x9 LB: > { %s477_s29 = sadd.s32 4294967295, %s755_s28   ;;  %s478_s30 = sadd.s32 4294967294, %s755_s28   ;;  %s755_s28 = sphi %s809_s28, %s21_s28   ;;  %s751_s27 = sphi %s807_s27, %s1012_s27   ;;  %s747_s26 = sphi %s805_s26, %s1011_s26   ;;  %s743_s25 = sphi %s803_s25, %s1010_s25   ;;  %s739_s24 = sphi %s801_s24, %s1009_s24   ;;  %s735_s23 = sphi %s799_s23, %s1008_s23   ;;  %s731_s22 = sphi %s797_s22, %s1007_s22   ;;  %s727_s21 = sphi %s795_s21, %s1006_s21   ;;  %s723_s20 = sphi %s793_s20, %s1005_s20   ;;  %s719_s19 = sphi %s791_s19, %s1004_s19   ;;  %s715_s18 = sphi %s789_s18, %s1003_s18  }
   0xa   : > { %s30_s6 = sadd.s32 1, %s747_s26  ;;  %s33_s7 = sadd.s32 1, %s751_s27 }
   0xb   : > { %p31_p0 = scmp.ge.s32.totalorder %s30_s6, 2  ;;  %s42_s8 = sadd.s32 1, %s735_s23 }
   0xc   : > { %p49_p1 = scmp.ne.s32.totalorder %s735_s23, %s731_s22  ;;  %p50_p2 = scmp.eq.s32.totalorder %s755_s28, 0 }
   0xd   : > { %s1014_s6 = smov (%p31_p0, %s30_s6), 0  ;;  %s1016_s7 = smov (!%p31_p0, %s33_s7), %s751_s27 }
   0xe   : > { %989 = sst [smem:[#allocation9_spill]] %s1014_s6  ;;  %s38_s9 = ssub.s32 %s747_s26, %s1014_s6 }
   0xf   : > { %p855_p3 = por %p50_p2, %p49_p1  ;;  %p35_p4 = scmp.ge.s32.totalorder %s1016_s7, 2 }
  0x10   : > { %p55_p5 = scmp.ne.s32.totalorder %s731_s22, %s727_s21  ;;  %p56_p6 = scmp.eq.s32.totalorder %s477_s29, 0 }
  0x11   : > { %s152_s11 = sadd.s32 1, %s723_s20  ;;  %s1018_s7 = smov (%p35_p4, %s1016_s7), 0 }
  0x12   : > { %991 = sst [smem:[#allocation10_spill]] %s1018_s7  ;;  %p863_p7 = por %p56_p6, %p55_p5 }
  0x13   : > { %p162_p8 = scmp.ne.s32.totalorder %s723_s20, %s719_s19  ;;  %s37_s13 = ssub.s32 %s751_s27, %s1018_s7 }
  0x14   : > { %p163_p9 = scmp.eq.s32.totalorder %s477_s29, 3  ;;  %s39_s14 = sor.u32 %s38_s9, %s37_s13 }
  0x15   : > { %p150_p10 = scmp.eq.s32.totalorder %s37_s13, 0  ;;  %p40_p11 = scmp.eq.s32.totalorder %s39_s14, 0 }
  0x16   : > { %p871_p12 = por %p163_p9, %p162_p8  ;;  %p168_p13 = scmp.ne.s32.totalorder %s719_s19, %s715_s18 }
  0x17   : > { %s876_s16 = scalar_select %p150_p10, %s723_s20, %s152_s11  }
  0x18   : > { %s993_s15 = scalar_select %p871_p12, 1, 0 }
  0x19   : > { %995 = sst [smem:[#allocation12_spill]] %s876_s16  ;;  %p169_p0 = scmp.eq.s32.totalorder %s478_s30, 3 }
  0x1a   : > { %994 = sst [smem:[#allocation11_spill]] %s993_s15  ;;  %p506_p1 = scmp.lt.s32.totalorder %s755_s28, 4 }
  0x1b   : > { %s879_s17 = scalar_select %p40_p11, %s735_s23, %s42_s8  }
  0x1c   : > { %p884_p2 = por %p169_p0, %p168_p13  ;;  %s201_s29 = sand.u32 1, %s735_s23  }
  0x1d   : > { %996 = sst [smem:[#allocation13_spill]] %s879_s17  ;;  %s481_s9 = sshll.u32 %s201_s29, 3 }
  0x1e   : > { %s482_s13 = sshll.u32 %s751_s27, 1  ;;  %s205_s7 = scalar_lea.vmem [#allocation3], %s481_s9 }
  0x1f   : > { %s209_s14 = sadd.s32 %s747_s26, %s482_s13  ;;  %s215_s6 = sshll.u32 %s205_s7, 4  ;;  %s216_s6 = int_to_ptr.vmem [resolvable:$true] %s215_s6 }
  0x20   : > { %s483_s15 = sshll.u32 %s209_s14, 3  ;;  %p499_p4 = pnand %p506_p1, %p855_p3 }
  0x21   : > { %s211_s17 = scalar_lea.hbm %s979_s0, %s483_s15  ;;  %p484_p5 = scmp.ge.s32.totalorder %s755_s28, 1 }
  0x22   : > { %s213_s30 = sshll.u32 %s211_s17, 4  ;;  %s202_s16 = scalar_lea.sflag [#allocation4], %s201_s29  ;;  %s214_s30 = int_to_ptr.hbm [resolvable:$true] %s213_s30 }
  0x23   : > { %501 = dma.hbm_to_vmem [thread:$0]  (!%p499_p4), %s214_s30, 128, %s216_s6, %s202_s16  }
  0x24   : > { %p220_p6 = scmp.lt.s32.totalorder %s755_s28, 5 }
  0x26   : > { %p221_p8 = pnand %p484_p5, %p220_p6 }
  0x27   : > { %s226_s9 = sand.u32 (!%p221_p8), 1, %s731_s22  }
  0x28   : > { %224 = sbr.rel (%p221_p8) target bundleno = 619 (0x26b), region = 40  ;;  %s485_s7 = sshll.u32 (!%p221_p8), %s226_s9, 3 }
  0x29   : > { %s227_s13 = scalar_lea.sflag (!%p221_p8), [#allocation4], %s226_s9  ;;  %s230_s14 = scalar_lea.vmem (!%p221_p8), [#allocation3], %s485_s7 }
  0x2d   : > { %706 = dma.done.wait (%p863_p7), %s227_s13, 128  }
  0x2e   : > { %708 = vsyncadd (%p863_p7), %s227_s13, 4294967168  ;;  %s255_s10 = sand.u32 1, %s719_s19   ;;  %p486_p3 = scmp.ne.s32.totalorder %s739_s24, 0 }
  0x2f   : > { %s906_s15 = scalar_lea.vmem [#allocation6], %s255_s10 }
  0x30   : > { %260 = sbr.rel (%p486_p3) target bundleno = 55 (0x37), region = 48 }
  0x35   : > { %vm261_vm0 = vcmask 57344   ;;  %v757_v0 = vmov 0.0  }
  0x36   : > { %262 = vst.msk [vmem:[#allocation2] sm:$0x1] %vm261_vm0, %v757_v0 }
  0x37 PF: > { %v263_v1 = vld [vmem:[%s230_s14] sm:$0xff]  ;;  %v758_v2 = vmov 0   ;;  %v295_v13 = vlaneseq  ;;  %vm300_vm1 = vcmask 57344   ;;  %p487_p7 = scmp.ne.s32.totalorder %s739_s24, 1 }
  0x38   : > { %265 = vadd.xlane.f32.xlu0 %v263_v1 }
  0x39   : > { %598 = vset.pattern.permute.xlu0 %v758_v2  ;;  %v296_v14 = vand.u32 127, %v295_v13 }
  0x3d   : > { %v264_v15 = vld [vmem:[#allocation2] sm:$0x1] }
  0xab   : > { %v266_v3 = vpop.xlane.xlu0 %265 }
  0xac   : > { %v268_v4 = vperm.slane %v266_v3, 0  ;;  %v269_v5 = vperm.slane %v266_v3, 1  ;;  %v270_v6 = vperm.slane %v266_v3, 2  ;;  %v271_v7 = vperm.slane %v266_v3, 3 }
  0xad   : > { %v272_v8 = vperm.slane %v266_v3, 4  ;;  %v273_v9 = vperm.slane %v266_v3, 5  ;;  %v274_v10 = vperm.slane %v266_v3, 6  ;;  %v275_v11 = vperm.slane %v266_v3, 7 }
  0xae   : > { %276 = vst [vmem:[#allocation1] ss:$9 sm:$0xff] %v268_v4 }
  0xaf   : > { %278 = vst [vmem:[#allocation1 + $0x1] ss:$9 sm:$0xff] %v269_v5 }
  0xb0   : > { %280 = vst [vmem:[#allocation1 + $0x2] ss:$9 sm:$0xff] %v270_v6 }
  0xb1   : > { %282 = vst [vmem:[#allocation1 + $0x3] ss:$9 sm:$0xff] %v271_v7 }
  0xb2   : > { %284 = vst [vmem:[#allocation1 + $0x4] ss:$9 sm:$0xff] %v272_v8 }
  0xb3   : > { %286 = vst [vmem:[#allocation1 + $0x5] ss:$9 sm:$0xff] %v273_v9 }
  0xb4   : > { %288 = vst [vmem:[#allocation1 + $0x6] ss:$9 sm:$0xff] %v274_v10 }
  0xb5   : > { %290 = vst [vmem:[#allocation1 + $0x7] ss:$9 sm:$0xff] %v275_v11 }
  0xbc   : > { %v291_v12 = vld [vmem:[#allocation1] sm:$0xff] }
  0xbd   : > { %293 = vperm.xlu0 %598, %v291_v12  }
 0x12f   : > { %v294_v16 = vpop.permute.xlu0 %293 }
 0x130   : > { %v297_v17 = vperm.slane %v294_v16, %v296_v14  ;;  %305 = sbr.rel (%p487_p7) target bundleno = 605 (0x25d), region = 52 }
 0x132   : > { %v299_v18 = vadd.f32 %v297_v17, %v264_v15 }
 0x134   : > { %301 = vst.msk [vmem:[#allocation2] sm:$0x1] %vm300_vm1, %v299_v18 }
 0x135   : > { %v308_v19 = vld [vmem:[%s980_s1] sm:$0xff]  ;;  %vm310_vm2 = vcmask 64512   ;;  %vm341_vm3 = vcmask 1041408   ;;  %vm337_vm4 = vcmask 15360  }
 0x136   : > { %329 = vmatpush.msra.mxu0 %v308_v19  ;;  %v335_v22 = vld [vmem:[%s982_s3] sm:$0x3] }
 0x137   : > { %489 = vmatpush.msk.msra.mxu1 %vm341_vm3, %v335_v22  ;;  %v309_v23 = vld [vmem:[%s981_s2] sm:$0x1] }
 0x138   : > { %v336_v27 = vld [vmem:[%s983_s4] sm:$0x1] }
 0x13b   : > { %v306_v20 = vld [vmem:[#allocation2] sm:$0x1] }
 0x13c   : > { %v307_v21 = vmul.f32 0.00390625, %v306_v20 }
 0x13e   : > { %488 = vmatmul.msk.f32.vlgmr.msra.gmra.mxu0 %vm310_vm2, %v307_v21 }
 0x1bb   : > { %v331_v24 = vpop.f32.mrf.mxu0 }
 0x1bc   : > { %v332_v25 = vadd.f32 %v331_v24, %v309_v23 }
 0x1be   : > { %v334_v26 = vmax.f32 %v332_v25, 0.0 }
 0x1c0   : > { %490 = vmatmul.msk.f32.vlgmr.msra.gmra.mxu1 %vm337_vm4, %v334_v26 }
 0x23d   : > { %v362_v28 = vpop.f32.mrf.mxu1 }
 0x23e   : > { %v363_v29 = vadd.f32 %v362_v28, %v336_v27 }
 0x240   : > { %v491_v30 = vmul.f32 -1.442695, %v363_v29 }
 0x242   : > { %599 = vpow2.f32 %v491_v30 }
 0x248   : > { %v600_v31 = vpop.eup %599 }
 0x249   : > { %v368_v32 = vadd.f32 1.0, %v600_v31 }
 0x24b   : > { %601 = vrcp.f32 %v368_v32  ;;  %v380_v36 = vand.u32 2147483648, %v368_v32  ;;  %v378_v38 = vand.u32 2147483647, %v368_v32  ;;  %vm374_vm6 = vweird.f32 %v368_v32 }
 0x24d   : > { %v381_v40 = vor.u32 1.1754944e-38, %v380_v36  ;;  %vm379_vm8 = vcmp.eq.f32.partialorder %v378_v38, 8.507059e+37 }
 0x251   : > { %v602_v33 = vpop.eup %601 }
 0x252   : > { %v370_v34 = vmul.f32 %v602_v33, %v368_v32  ;;  %vm375_vm5 = vweird.f32 %v602_v33 }
 0x253   : > { %vm376_vm7 = vmor %vm374_vm6, %vm375_vm5 }
 0x254   : > { %v371_v35 = vsub.f32 1.0, %v370_v34 }
 0x256   : > { %v372_v37 = vmul.f32 %v602_v33, %v371_v35 }
 0x258   : > { %v373_v39 = vadd.f32 %v602_v33, %v372_v37 }
 0x25a   : > { %v377_v41 = vsel %vm376_vm7, %v602_v33, %v373_v39 }
 0x25b   : > { %v382_v42 = vsel %vm379_vm8, %v381_v40, %v377_v41 }
 0x25c   : > { %384 = vst.msk [vmem:[%s906_s15] sm:$0x1] %vm300_vm1, %v382_v42 }
 0x25d PF: > { %s394_s13 = scalar_lea.hbm %s984_s5, %s743_s25  ;;  %s396_s14 = sshll.u32 %s906_s15, 4  ;;  %s397_s14 = int_to_ptr.vmem [resolvable:$true] %s396_s14 }
 0x25e   : > { %s398_s6 = sshll.u32 %s394_s13, 4  ;;  %s386_s12 = scalar_lea.sflag [#allocation5], %s255_s10  ;;  %s399_s6 = int_to_ptr.hbm [resolvable:$true] %s398_s6 }
 0x25f   : > { %s647_s16 = sshra.s32 %s399_s6, 4  ;;  %s653_s24 = scalar_lea.hbm %s984_s5, 2  ;;  %s648_s16 = int_to_ptr.hbm [resolvable:$true] %s647_s16 }
 0x260   : > { %s649_s17 = scalar_lea.hbm %s648_s16, 1  ;;  %p654_p13 = scmp.lt.s32.totalorder %s648_s16, %s984_s5 }
 0x261   : > { %p650_p9 = scmp.ne.s32.totalorder %s648_s16, %s649_s17  ;;  %p655_p0 = scmp.lt.s32.totalorder %s653_s24, %s649_s17 }
 0x263   : > { %p651_p10 = pnand %p650_p9, %p871_p12  ;;  %p656_p1 = por %p655_p0, %p654_p13 }
 0x265   : > { %p652_p11 = pneg %p651_p10 }
 0x267   : > { %p657_p4 = pnand %p656_p1, %p652_p11 }
 0x269   : > { %660 = shalt.err (!%p657_p4)
}
 0x26a   : > { %496 = dma.vmem_to_hbm [thread:$0]  (%p871_p12), %s397_s14, 16, %s399_s6, %s386_s12  }
 0x26b PF: > { %p507_p5 = scmp.ge.s32.totalorder %s755_s28, 2  ;;  %s410_s25 = sand.u32 1, %s715_s18  }
 0x26c   : > { %s411_s10 = scalar_lea.sflag [#allocation5], %s410_s25 }
 0x26d   : > { %p503_p6 = pnand %p507_p5, %p884_p2 }
 0x26f   : > { %p504_p8 = pneg %p503_p6 }
 0x271   : > { %710 = dma.done.wait (%p504_p8), %s411_s10, 16  }
 0x272   : > { %712 = vsyncadd (%p504_p8), %s411_s10, 4294967280  ;;  %s21_s28 = sadd.s32 1, %s755_s28   ;;  %s999_s15 = sld [smem:[#allocation12_spill]] }
 0x273   : > { %p18_p3 = scmp.ge.s32.totalorder %s21_s28, 6   ;;  %s1000_s9 = sld [smem:[#allocation13_spill]] }
 0x274   : > { %s1001_s7 = sld [smem:[#allocation9_spill]]  ;;  %s1003_s18 = smov %s719_s19 }
 0x275   : > { %s1002_s13 = sld [smem:[#allocation10_spill]]  ;;  %s1004_s19 = smov %s723_s20 }
 0x276   : > { %s1006_s21 = smov %s731_s22  ;;  %s1007_s22 = smov %s735_s23 }
 0x277   : > { %s1009_s24 = smov %s747_s26  ;;  %s1010_s25 = smov %s751_s27 }
 0x278   : > { %s1005_s20 = smov %s999_s15  ;;  %20 = sbr.rel (!%p18_p3) target bundleno = 9 (0x9), region = 100 }
 0x279   : > { %s1008_s23 = smov %s1000_s9 }
 0x27a   : > { %s1011_s26 = smov %s1001_s7 }
 0x27b   : > { %s1012_s27 = smov %s1002_s13 }
 0x27d   :  { %416 = vsyncpa [#allocation4], 1 }
 0x27e   :  { %418 = vsyncpa [#allocation4 + $0x1], 1 }
 0x27f   :  { %419 = vsyncpa [#allocation5], 1 }
 0x280   :  { %421 = vsyncpa [#allocation5 + $0x1], 1 }

</bundles_post_ra>
